<compile_context>
chip_gen: v6e
topology: v6e:2x2x1
jax: 0.10.0
libtpu: 0.0.40
codegen_flags: <defaults>
</compile_context>

<pallas_src>
import functools

import jax
import jax.numpy as jnp
from jax.experimental import pallas as pl
from jax.experimental.pallas import tpu as pltpu


# ------------------------------ fused kernel --------------------------------

def _flowgnn_kernel(*refs, num_layer, num_path, num_path_node):
    """refs = (adjT, h0T, [wg, bg, wd, bd] * num_layer, outT, h_scr)."""
    n_in = 2 + 4 * num_layer
    adjt_ref, h0t_ref = refs[0], refs[1]
    param_refs = refs[2:n_in]
    out_ref = refs[n_in]
    h_scr = refs[n_in + 1]

    n = adjt_ref.shape[0]
    n_edge = n - num_path_node                 # edge-node columns come first
    n_grp = num_path_node // num_path          # number of path groups
    out_w = num_layer + 1

    adjt = adjt_ref[...]                       # [N, N] bf16, A^T (permuted node order)
    h0t = h0t_ref[...]                         # [1, N] f32, h0^T

    # Pre-fill every feature row with h0^T: row 0 is the initial embedding and
    # row i+1 is exactly the column appended by layer i's concat([h, h0], -1),
    # because layer i only overwrites rows 0..i.
    h_scr[...] = jnp.broadcast_to(h0t, (out_w, n))

    for i in range(num_layer):                 # static unroll (num_layer is small)
        f = i + 1
        wg_ref, bg_ref, wd_ref, bd_ref = param_refs[4 * i:4 * i + 4]

        # --- GNN linear (feature-major):  hg^T = Wg @ h^T + bg ----------------
        h_t = h_scr[0:f, :]                                            # [f, N]
        hg_t = jnp.dot(wg_ref[...], h_t,
                       preferred_element_type=jnp.float32) + bg_ref[...]

        # --- spmm:  hs = A @ hg  ->  hs^T = hg^T @ A^T  (bf16 in, f32 acc) ----
        hs_t = jnp.dot(hg_t.astype(jnp.bfloat16), adjt,
                       preferred_element_type=jnp.float32)              # [f, N]

        # Edge-node columns are final for this layer (lane-dense store).
        if n_edge > 0:
            h_scr[0:f, 0:n_edge] = hs_t[:, 0:n_edge]

        # --- path-node DNN as a block matmul -----------------------------------
        # Path nodes are stored slot-major (lane column n_edge + r*n_grp + p),
        # so the PyTorch row-major reshape's "row r of group p" is simply the
        # contiguous lane block r:
        #   z[s*f+g, p] = bd[s*f+g] + sum_{r,c} Wd[s*f+g, r*f+c] * hs^T[c, blk_r[p]]
        z = jnp.zeros((num_path * f, n_grp), jnp.float32)
        for r in range(num_path):
            blk = hs_t[:, n_edge + r * n_grp: n_edge + (r + 1) * n_grp]  # [f, n_grp]
            z = z + jnp.dot(wd_ref[:, r * f:(r + 1) * f], blk,
                            preferred_element_type=jnp.float32)
        z = z + bd_ref[...]                                              # [npath*f, n_grp]

        # Contiguous lane-block writebacks of the path-node update.
        for s in range(num_path):
            h_scr[0:f, n_edge + s * n_grp: n_edge + (s + 1) * n_grp] = \
                z[s * f:(s + 1) * f, :]

        # h0 "concat" (feature row f) was pre-filled -> nothing to do.

    # return h[-num_path_node:, :]^T   (width = num_layer + 1, lane-dense)
    out_ref[...] = h_scr[:, n_edge:n]


def _full_spec(shape):
    # Small arrays: a single full-array block resident in VMEM (grid = ()).
    return pl.BlockSpec(shape, lambda: (0,) * len(shape))


@functools.partial(jax.jit, static_argnums=(3, 4))
def flowgnn_forward(h0, adj, params, num_path, num_path_node):
    """Fused Pallas forward. params[i] = (W_gnn, b_gnn, W_dnn, b_dnn)."""
    num_layer = len(params)
    n = h0.shape[0]
    assert num_path_node % num_path == 0, "num_path_node must be a multiple of num_path"
    n_grp = num_path_node // num_path
    n_edge = n - num_path_node
    out_w = num_layer + 1

    # Path-node permutation: old path index m = num_path*p + r  ->  new index
    # r*n_grp + p, so each path slot r is a contiguous lane block in-kernel.
    perm_path = jnp.arange(num_path_node).reshape(n_grp, num_path).T.reshape(-1)
    perm = jnp.concatenate([jnp.arange(n_edge), n_edge + perm_path])
    inv_perm_path = jnp.argsort(perm_path)

    h0f = h0.astype(jnp.float32)
    h0t = h0f[perm].T                                                   # [1, N]
    adjt = adj.astype(jnp.float32)[perm][:, perm].T.astype(jnp.bfloat16)  # A^T, bf16

    inputs = [adjt, h0t]
    in_specs = [_full_spec(adjt.shape), _full_spec(h0t.shape)]
    for wg, bg, wd, bd in params:
        wgf = wg.astype(jnp.float32)                 # [f, f]  used as Wg @ h^T
        bgc = bg.reshape(-1, 1).astype(jnp.float32)  # [f, 1]  lane-broadcast column
        wdf = wd.astype(jnp.float32)                 # [d, d]  used as Wd @ y^T
        bdc = bd.reshape(-1, 1).astype(jnp.float32)  # [d, 1]
        inputs += [wgf, bgc, wdf, bdc]
        in_specs += [_full_spec(wgf.shape), _full_spec(bgc.shape),
                     _full_spec(wdf.shape), _full_spec(bdc.shape)]

    kernel = functools.partial(_flowgnn_kernel, num_layer=num_layer,
                               num_path=num_path, num_path_node=num_path_node)

    out_t = pl.pallas_call(
        kernel,
        out_shape=jax.ShapeDtypeStruct((out_w, num_path_node), jnp.float32),
        in_specs=in_specs,
        out_specs=_full_spec((out_w, num_path_node)),
        scratch_shapes=[pltpu.VMEM((out_w, n), jnp.float32)],  # resident h_i^T
        compiler_params=pltpu.CompilerParams(vmem_limit_bytes=64 * 1024 * 1024),
    )(*inputs)

    # Feature-major + permuted  ->  [num_path_node, num_layer+1] in original order.
    return out_t.T[inv_perm_path]


# ---------------------------- pure-JAX reference -----------------------------

def flowgnn_reference(h0, adj, params, num_path, num_path_node):
    """Mirrors the PyTorch forward exactly (dense spmm, f32)."""
    n = h0.shape[0]
    h = h0
    for i, (wg, bg, wd, bd) in enumerate(params):
        f = i + 1
        hg = h @ wg.T + bg
        hs = adj @ hg
        path = hs[n - num_path_node:, :].reshape(
            num_path_node // num_path, num_path * f)
        path = (path @ wd.T + bd).reshape(num_path_node, f)
        h = jnp.concatenate([hs[: n - num_path_node, :], path], axis=0)
        h = jnp.concatenate([h, h0], axis=-1)
    return h[-num_path_node:, :]


# --------------------------------- main --------------------------------------

if __name__ == "__main__":
    # Small synthetic topology consistent with FlowGNN.__init__:
    num_layer = 3
    num_path = 4
    num_path_node = 16          # 4 demand pairs * 4 paths
    num_edge_node = 8
    n_nodes = num_edge_node + num_path_node   # 24

    key = jax.random.PRNGKey(0)
    k_h0, k_adj_m, k_adj_v, k_w = jax.random.split(key, 4)

    # Initial embeddings h_0 : [N, 1]  (Linear(1,1) at layer 0 implies 1 feature)
    h0 = jax.random.normal(k_h0, (n_nodes, 1), dtype=jnp.float32)

    # Deterministic sparse adjacency densified to [N, N]
    mask = jax.random.uniform(k_adj_m, (n_nodes, n_nodes)) < 0.25
    vals = jax.random.uniform(k_adj_v, (n_nodes, n_nodes), dtype=jnp.float32)
    adj = jnp.where(mask, vals, 0.0).astype(jnp.float32)

    # Deterministic parameter init (synthetic stand-in for weight_initialization)
    params = []
    for i in range(num_layer):
        f = i + 1
        d = num_path * f
        k_w, k1, k2, k3, k4 = jax.random.split(k_w, 5)
        wg = jax.random.normal(k1, (f, f), dtype=jnp.float32) * 0.3
        bg = jax.random.normal(k2, (f,), dtype=jnp.float32) * 0.1
        wd = jax.random.normal(k3, (d, d), dtype=jnp.float32) * 0.3
        bd = jax.random.normal(k4, (d,), dtype=jnp.float32) * 0.1
        params.append((wg, bg, wd, bd))

    out = flowgnn_forward(h0, adj, params, num_path, num_path_node)
    out = jax.block_until_ready(out)

    ref = flowgnn_reference(h0, adj, params, num_path, num_path_node)
    assert out.shape == (num_path_node, num_layer + 1), out.shape
    # bf16 adjacency / spmm operands (f32 accumulation) => slightly looser tol.
    max_err = float(jnp.max(jnp.abs(out - ref)))
    assert jnp.allclose(out, ref, rtol=5e-2, atol=5e-2), (
        "mismatch vs reference; max abs err = %g" % max_err)

    print("KERNEL_OK")
</pallas_src>

<mosaic_0001>
module attributes {stable_mosaic.version = 11 : i64} {
  func.func @_flowgnn_kernel(%arg0: memref<24x24xbf16, #tpu.memory_space<vmem>>, %arg1: memref<1x24xf32, #tpu.memory_space<vmem>>, %arg2: memref<1x1xf32, #tpu.memory_space<vmem>>, %arg3: memref<1x1xf32, #tpu.memory_space<vmem>>, %arg4: memref<4x4xf32, #tpu.memory_space<vmem>>, %arg5: memref<4x1xf32, #tpu.memory_space<vmem>>, %arg6: memref<2x2xf32, #tpu.memory_space<vmem>>, %arg7: memref<2x1xf32, #tpu.memory_space<vmem>>, %arg8: memref<8x8xf32, #tpu.memory_space<vmem>>, %arg9: memref<8x1xf32, #tpu.memory_space<vmem>>, %arg10: memref<3x3xf32, #tpu.memory_space<vmem>>, %arg11: memref<3x1xf32, #tpu.memory_space<vmem>>, %arg12: memref<12x12xf32, #tpu.memory_space<vmem>>, %arg13: memref<12x1xf32, #tpu.memory_space<vmem>>, %arg14: memref<4x16xf32, #tpu.memory_space<vmem>>, %arg15: memref<4x24xf32, #tpu.memory_space<vmem>>) attributes {dimension_semantics = [], scalar_prefetch = 0 : i64, scratch_operands = 1 : i64, tpu.core_type = #tpu.core_type<tc>} {
    %c0 = arith.constant 0 : index
    %c0_0 = arith.constant 0 : index
    %0 = vector.load %arg0[%c0, %c0_0] : memref<24x24xbf16, #tpu.memory_space<vmem>>, vector<24x24xbf16>
    %c0_1 = arith.constant 0 : index
    %c0_2 = arith.constant 0 : index
    %1 = vector.load %arg1[%c0_1, %c0_2] : memref<1x24xf32, #tpu.memory_space<vmem>>, vector<1x24xf32>
    %2 = vector.shape_cast %1 : vector<1x24xf32> to vector<1x24xf32>
    %3 = vector.broadcast %2 : vector<1x24xf32> to vector<4x24xf32>
    %c0_3 = arith.constant 0 : index
    %c0_4 = arith.constant 0 : index
    %4 = vector.load %arg15[%c0_3, %c0_4] : memref<4x24xf32, #tpu.memory_space<vmem>>, vector<4x24xf32>
    tpu.vector_store %arg15[%c0_3, %c0_4], %3 {strides = array<i32>} : memref<4x24xf32, #tpu.memory_space<vmem>>, vector<4x24xf32>,
    %c0_5 = arith.constant 0 : index
    %c0_6 = arith.constant 0 : index
    %5 = vector.load %arg15[%c0_5, %c0_6] : memref<4x24xf32, #tpu.memory_space<vmem>>, vector<1x24xf32>
    %c0_7 = arith.constant 0 : index
    %c0_8 = arith.constant 0 : index
    %6 = vector.load %arg2[%c0_7, %c0_8] : memref<1x1xf32, #tpu.memory_space<vmem>>, vector<1x1xf32>
    %cst = arith.constant dense<0.000000e+00> : vector<1x24xf32>
    %7 = tpu.matmul %6, %5, %cst {dimension_numbers = #tpu.dot_dimension_numbers<[1], [0], [0], [1], [0, 0, 1, 1], [], []>} : vector<1x1xf32>, vector<1x24xf32>, vector<1x24xf32> -> vector<1x24xf32>
    %c0_9 = arith.constant 0 : index
    %c0_10 = arith.constant 0 : index
    %8 = vector.load %arg3[%c0_9, %c0_10] : memref<1x1xf32, #tpu.memory_space<vmem>>, vector<1x1xf32>
    %9 = vector.broadcast %8 : vector<1x1xf32> to vector<1x24xf32>
    %10 = arith.addf %7, %9 : vector<1x24xf32>
    %11 = arith.truncf %10 : vector<1x24xf32> to vector<1x24xbf16>
    %cst_11 = arith.constant dense<0.000000e+00> : vector<1x24xf32>
    %12 = tpu.matmul %11, %0, %cst_11 {dimension_numbers = #tpu.dot_dimension_numbers<[1], [0], [0], [1], [0, 0, 1, 1], [], []>} : vector<1x24xbf16>, vector<24x24xbf16>, vector<1x24xf32> -> vector<1x24xf32>
    %13 = vector.extract_strided_slice %12 {offsets = [0, 0], sizes = [1, 8], strides = [1, 1]} : vector<1x24xf32> to vector<1x8xf32>
    %c0_12 = arith.constant 0 : index
    %c0_13 = arith.constant 0 : index
    %14 = vector.load %arg15[%c0_12, %c0_13] : memref<4x24xf32, #tpu.memory_space<vmem>>, vector<1x8xf32>
    tpu.vector_store %arg15[%c0_12, %c0_13], %13 {strides = array<i32>} : memref<4x24xf32, #tpu.memory_space<vmem>>, vector<1x8xf32>,
    %cst_14 = arith.constant 0.000000e+00 : f32
    %15 = vector.broadcast %cst_14 : f32 to vector<4x4xf32>
    %16 = vector.extract_strided_slice %12 {offsets = [0, 8], sizes = [1, 4], strides = [1, 1]} : vector<1x24xf32> to vector<1x4xf32>
    %c0_15 = arith.constant 0 : index
    %c0_16 = arith.constant 0 : index
    %17 = vector.load %arg4[%c0_15, %c0_16] : memref<4x4xf32, #tpu.memory_space<vmem>>, vector<4x1xf32>
    %cst_17 = arith.constant dense<0.000000e+00> : vector<4x4xf32>
    %18 = tpu.matmul %17, %16, %cst_17 {dimension_numbers = #tpu.dot_dimension_numbers<[1], [0], [0], [1], [0, 0, 1, 1], [], []>} : vector<4x1xf32>, vector<1x4xf32>, vector<4x4xf32> -> vector<4x4xf32>
    %19 = arith.addf %15, %18 : vector<4x4xf32>
    %20 = vector.extract_strided_slice %12 {offsets = [0, 12], sizes = [1, 4], strides = [1, 1]} : vector<1x24xf32> to vector<1x4xf32>
    %c0_18 = arith.constant 0 : index
    %c1 = arith.constant 1 : index
    %21 = vector.load %arg4[%c0_18, %c1] : memref<4x4xf32, #tpu.memory_space<vmem>>, vector<4x1xf32>
    %cst_19 = arith.constant dense<0.000000e+00> : vector<4x4xf32>
    %22 = tpu.matmul %21, %20, %cst_19 {dimension_numbers = #tpu.dot_dimension_numbers<[1], [0], [0], [1], [0, 0, 1, 1], [], []>} : vector<4x1xf32>, vector<1x4xf32>, vector<4x4xf32> -> vector<4x4xf32>
    %23 = arith.addf %19, %22 : vector<4x4xf32>
    %24 = vector.extract_strided_slice %12 {offsets = [0, 16], sizes = [1, 4], strides = [1, 1]} : vector<1x24xf32> to vector<1x4xf32>
    %c0_20 = arith.constant 0 : index
    %c2 = arith.constant 2 : index
    %25 = vector.load %arg4[%c0_20, %c2] : memref<4x4xf32, #tpu.memory_space<vmem>>, vector<4x1xf32>
    %cst_21 = arith.constant dense<0.000000e+00> : vector<4x4xf32>
    %26 = tpu.matmul %25, %24, %cst_21 {dimension_numbers = #tpu.dot_dimension_numbers<[1], [0], [0], [1], [0, 0, 1, 1], [], []>} : vector<4x1xf32>, vector<1x4xf32>, vector<4x4xf32> -> vector<4x4xf32>
    %27 = arith.addf %23, %26 : vector<4x4xf32>
    %28 = vector.extract_strided_slice %12 {offsets = [0, 20], sizes = [1, 4], strides = [1, 1]} : vector<1x24xf32> to vector<1x4xf32>
    %c0_22 = arith.constant 0 : index
    %c3 = arith.constant 3 : index
    %29 = vector.load %arg4[%c0_22, %c3] : memref<4x4xf32, #tpu.memory_space<vmem>>, vector<4x1xf32>
    %cst_23 = arith.constant dense<0.000000e+00> : vector<4x4xf32>
    %30 = tpu.matmul %29, %28, %cst_23 {dimension_numbers = #tpu.dot_dimension_numbers<[1], [0], [0], [1], [0, 0, 1, 1], [], []>} : vector<4x1xf32>, vector<1x4xf32>, vector<4x4xf32> -> vector<4x4xf32>
    %31 = arith.addf %27, %30 : vector<4x4xf32>
    %c0_24 = arith.constant 0 : index
    %c0_25 = arith.constant 0 : index
    %32 = vector.load %arg5[%c0_24, %c0_25] : memref<4x1xf32, #tpu.memory_space<vmem>>, vector<4x1xf32>
    %33 = vector.broadcast %32 : vector<4x1xf32> to vector<4x4xf32>
    %34 = arith.addf %31, %33 : vector<4x4xf32>
    %35 = vector.extract_strided_slice %34 {offsets = [0, 0], sizes = [1, 4], strides = [1, 1]} : vector<4x4xf32> to vector<1x4xf32>
    %c0_26 = arith.constant 0 : index
    %c8 = arith.constant 8 : index
    %36 = vector.load %arg15[%c0_26, %c8] : memref<4x24xf32, #tpu.memory_space<vmem>>, vector<1x4xf32>
    tpu.vector_store %arg15[%c0_26, %c8], %35 {strides = array<i32>} : memref<4x24xf32, #tpu.memory_space<vmem>>, vector<1x4xf32>,
    %37 = vector.extract_strided_slice %34 {offsets = [1, 0], sizes = [1, 4], strides = [1, 1]} : vector<4x4xf32> to vector<1x4xf32>
    %c0_27 = arith.constant 0 : index
    %c12 = arith.constant 12 : index
    %38 = vector.load %arg15[%c0_27, %c12] : memref<4x24xf32, #tpu.memory_space<vmem>>, vector<1x4xf32>
    tpu.vector_store %arg15[%c0_27, %c12], %37 {strides = array<i32>} : memref<4x24xf32, #tpu.memory_space<vmem>>, vector<1x4xf32>,
    %39 = vector.extract_strided_slice %34 {offsets = [2, 0], sizes = [1, 4], strides = [1, 1]} : vector<4x4xf32> to vector<1x4xf32>
    %c0_28 = arith.constant 0 : index
    %c16 = arith.constant 16 : index
    %40 = vector.load %arg15[%c0_28, %c16] : memref<4x24xf32, #tpu.memory_space<vmem>>, vector<1x4xf32>
    tpu.vector_store %arg15[%c0_28, %c16], %39 {strides = array<i32>} : memref<4x24xf32, #tpu.memory_space<vmem>>, vector<1x4xf32>,
    %41 = vector.extract_strided_slice %34 {offsets = [3, 0], sizes = [1, 4], strides = [1, 1]} : vector<4x4xf32> to vector<1x4xf32>
    %c0_29 = arith.constant 0 : index
    %c20 = arith.constant 20 : index
    %42 = vector.load %arg15[%c0_29, %c20] : memref<4x24xf32, #tpu.memory_space<vmem>>, vector<1x4xf32>
    tpu.vector_store %arg15[%c0_29, %c20], %41 {strides = array<i32>} : memref<4x24xf32, #tpu.memory_space<vmem>>, vector<1x4xf32>,
    %c0_30 = arith.constant 0 : index
    %c0_31 = arith.constant 0 : index
    %43 = vector.load %arg15[%c0_30, %c0_31] : memref<4x24xf32, #tpu.memory_space<vmem>>, vector<2x24xf32>
    %c0_32 = arith.constant 0 : index
    %c0_33 = arith.constant 0 : index
    %44 = vector.load %arg6[%c0_32, %c0_33] : memref<2x2xf32, #tpu.memory_space<vmem>>, vector<2x2xf32>
    %cst_34 = arith.constant dense<0.000000e+00> : vector<2x24xf32>
    %45 = tpu.matmul %44, %43, %cst_34 {dimension_numbers = #tpu.dot_dimension_numbers<[1], [0], [0], [1], [0, 0, 1, 1], [], []>} : vector<2x2xf32>, vector<2x24xf32>, vector<2x24xf32> -> vector<2x24xf32>
    %c0_35 = arith.constant 0 : index
    %c0_36 = arith.constant 0 : index
    %46 = vector.load %arg7[%c0_35, %c0_36] : memref<2x1xf32, #tpu.memory_space<vmem>>, vector<2x1xf32>
    %47 = vector.broadcast %46 : vector<2x1xf32> to vector<2x24xf32>
    %48 = arith.addf %45, %47 : vector<2x24xf32>
    %49 = arith.truncf %48 : vector<2x24xf32> to vector<2x24xbf16>
    %cst_37 = arith.constant dense<0.000000e+00> : vector<2x24xf32>
    %50 = tpu.matmul %49, %0, %cst_37 {dimension_numbers = #tpu.dot_dimension_numbers<[1], [0], [0], [1], [0, 0, 1, 1], [], []>} : vector<2x24xbf16>, vector<24x24xbf16>, vector<2x24xf32> -> vector<2x24xf32>
    %51 = vector.extract_strided_slice %50 {offsets = [0, 0], sizes = [2, 8], strides = [1, 1]} : vector<2x24xf32> to vector<2x8xf32>
    %c0_38 = arith.constant 0 : index
    %c0_39 = arith.constant 0 : index
    %52 = vector.load %arg15[%c0_38, %c0_39] : memref<4x24xf32, #tpu.memory_space<vmem>>, vector<2x8xf32>
    tpu.vector_store %arg15[%c0_38, %c0_39], %51 {strides = array<i32>} : memref<4x24xf32, #tpu.memory_space<vmem>>, vector<2x8xf32>,
    %cst_40 = arith.constant 0.000000e+00 : f32
    %53 = vector.broadcast %cst_40 : f32 to vector<8x4xf32>
    %54 = vector.extract_strided_slice %50 {offsets = [0, 8], sizes = [2, 4], strides = [1, 1]} : vector<2x24xf32> to vector<2x4xf32>
    %c0_41 = arith.constant 0 : index
    %c0_42 = arith.constant 0 : index
    %55 = vector.load %arg8[%c0_41, %c0_42] : memref<8x8xf32, #tpu.memory_space<vmem>>, vector<8x2xf32>
    %cst_43 = arith.constant dense<0.000000e+00> : vector<8x4xf32>
    %56 = tpu.matmul %55, %54, %cst_43 {dimension_numbers = #tpu.dot_dimension_numbers<[1], [0], [0], [1], [0, 0, 1, 1], [], []>} : vector<8x2xf32>, vector<2x4xf32>, vector<8x4xf32> -> vector<8x4xf32>
    %57 = arith.addf %53, %56 : vector<8x4xf32>
    %58 = vector.extract_strided_slice %50 {offsets = [0, 12], sizes = [2, 4], strides = [1, 1]} : vector<2x24xf32> to vector<2x4xf32>
    %c0_44 = arith.constant 0 : index
    %c2_45 = arith.constant 2 : index
    %59 = vector.load %arg8[%c0_44, %c2_45] : memref<8x8xf32, #tpu.memory_space<vmem>>, vector<8x2xf32>
    %cst_46 = arith.constant dense<0.000000e+00> : vector<8x4xf32>
    %60 = tpu.matmul %59, %58, %cst_46 {dimension_numbers = #tpu.dot_dimension_numbers<[1], [0], [0], [1], [0, 0, 1, 1], [], []>} : vector<8x2xf32>, vector<2x4xf32>, vector<8x4xf32> -> vector<8x4xf32>
    %61 = arith.addf %57, %60 : vector<8x4xf32>
    %62 = vector.extract_strided_slice %50 {offsets = [0, 16], sizes = [2, 4], strides = [1, 1]} : vector<2x24xf32> to vector<2x4xf32>
    %c0_47 = arith.constant 0 : index
    %c4 = arith.constant 4 : index
    %63 = vector.load %arg8[%c0_47, %c4] : memref<8x8xf32, #tpu.memory_space<vmem>>, vector<8x2xf32>
    %cst_48 = arith.constant dense<0.000000e+00> : vector<8x4xf32>
    %64 = tpu.matmul %63, %62, %cst_48 {dimension_numbers = #tpu.dot_dimension_numbers<[1], [0], [0], [1], [0, 0, 1, 1], [], []>} : vector<8x2xf32>, vector<2x4xf32>, vector<8x4xf32> -> vector<8x4xf32>
    %65 = arith.addf %61, %64 : vector<8x4xf32>
    %66 = vector.extract_strided_slice %50 {offsets = [0, 20], sizes = [2, 4], strides = [1, 1]} : vector<2x24xf32> to vector<2x4xf32>
    %c0_49 = arith.constant 0 : index
    %c6 = arith.constant 6 : index
    %67 = vector.load %arg8[%c0_49, %c6] : memref<8x8xf32, #tpu.memory_space<vmem>>, vector<8x2xf32>
    %cst_50 = arith.constant dense<0.000000e+00> : vector<8x4xf32>
    %68 = tpu.matmul %67, %66, %cst_50 {dimension_numbers = #tpu.dot_dimension_numbers<[1], [0], [0], [1], [0, 0, 1, 1], [], []>} : vector<8x2xf32>, vector<2x4xf32>, vector<8x4xf32> -> vector<8x4xf32>
    %69 = arith.addf %65, %68 : vector<8x4xf32>
    %c0_51 = arith.constant 0 : index
    %c0_52 = arith.constant 0 : index
    %70 = vector.load %arg9[%c0_51, %c0_52] : memref<8x1xf32, #tpu.memory_space<vmem>>, vector<8x1xf32>
    %71 = vector.broadcast %70 : vector<8x1xf32> to vector<8x4xf32>
    %72 = arith.addf %69, %71 : vector<8x4xf32>
    %73 = vector.extract_strided_slice %72 {offsets = [0, 0], sizes = [2, 4], strides = [1, 1]} : vector<8x4xf32> to vector<2x4xf32>
    %c0_53 = arith.constant 0 : index
    %c8_54 = arith.constant 8 : index
    %74 = vector.load %arg15[%c0_53, %c8_54] : memref<4x24xf32, #tpu.memory_space<vmem>>, vector<2x4xf32>
    tpu.vector_store %arg15[%c0_53, %c8_54], %73 {strides = array<i32>} : memref<4x24xf32, #tpu.memory_space<vmem>>, vector<2x4xf32>,
    %75 = vector.extract_strided_slice %72 {offsets = [2, 0], sizes = [2, 4], strides = [1, 1]} : vector<8x4xf32> to vector<2x4xf32>
    %c0_55 = arith.constant 0 : index
    %c12_56 = arith.constant 12 : index
    %76 = vector.load %arg15[%c0_55, %c12_56] : memref<4x24xf32, #tpu.memory_space<vmem>>, vector<2x4xf32>
    tpu.vector_store %arg15[%c0_55, %c12_56], %75 {strides = array<i32>} : memref<4x24xf32, #tpu.memory_space<vmem>>, vector<2x4xf32>,
    %77 = vector.extract_strided_slice %72 {offsets = [4, 0], sizes = [2, 4], strides = [1, 1]} : vector<8x4xf32> to vector<2x4xf32>
    %c0_57 = arith.constant 0 : index
    %c16_58 = arith.constant 16 : index
    %78 = vector.load %arg15[%c0_57, %c16_58] : memref<4x24xf32, #tpu.memory_space<vmem>>, vector<2x4xf32>
    tpu.vector_store %arg15[%c0_57, %c16_58], %77 {strides = array<i32>} : memref<4x24xf32, #tpu.memory_space<vmem>>, vector<2x4xf32>,
    %79 = vector.extract_strided_slice %72 {offsets = [6, 0], sizes = [2, 4], strides = [1, 1]} : vector<8x4xf32> to vector<2x4xf32>
    %c0_59 = arith.constant 0 : index
    %c20_60 = arith.constant 20 : index
    %80 = vector.load %arg15[%c0_59, %c20_60] : memref<4x24xf32, #tpu.memory_space<vmem>>, vector<2x4xf32>
    tpu.vector_store %arg15[%c0_59, %c20_60], %79 {strides = array<i32>} : memref<4x24xf32, #tpu.memory_space<vmem>>, vector<2x4xf32>,
    %c0_61 = arith.constant 0 : index
    %c0_62 = arith.constant 0 : index
    %81 = vector.load %arg15[%c0_61, %c0_62] : memref<4x24xf32, #tpu.memory_space<vmem>>, vector<3x24xf32>
    %c0_63 = arith.constant 0 : index
    %c0_64 = arith.constant 0 : index
    %82 = vector.load %arg10[%c0_63, %c0_64] : memref<3x3xf32, #tpu.memory_space<vmem>>, vector<3x3xf32>
    %cst_65 = arith.constant dense<0.000000e+00> : vector<3x24xf32>
    %83 = tpu.matmul %82, %81, %cst_65 {dimension_numbers = #tpu.dot_dimension_numbers<[1], [0], [0], [1], [0, 0, 1, 1], [], []>} : vector<3x3xf32>, vector<3x24xf32>, vector<3x24xf32> -> vector<3x24xf32>
    %c0_66 = arith.constant 0 : index
    %c0_67 = arith.constant 0 : index
    %84 = vector.load %arg11[%c0_66, %c0_67] : memref<3x1xf32, #tpu.memory_space<vmem>>, vector<3x1xf32>
    %85 = vector.broadcast %84 : vector<3x1xf32> to vector<3x24xf32>
    %86 = arith.addf %83, %85 : vector<3x24xf32>
    %87 = arith.truncf %86 : vector<3x24xf32> to vector<3x24xbf16>
    %cst_68 = arith.constant dense<0.000000e+00> : vector<3x24xf32>
    %88 = tpu.matmul %87, %0, %cst_68 {dimension_numbers = #tpu.dot_dimension_numbers<[1], [0], [0], [1], [0, 0, 1, 1], [], []>} : vector<3x24xbf16>, vector<24x24xbf16>, vector<3x24xf32> -> vector<3x24xf32>
    %89 = vector.extract_strided_slice %88 {offsets = [0, 0], sizes = [3, 8], strides = [1, 1]} : vector<3x24xf32> to vector<3x8xf32>
    %c0_69 = arith.constant 0 : index
    %c0_70 = arith.constant 0 : index
    %90 = vector.load %arg15[%c0_69, %c0_70] : memref<4x24xf32, #tpu.memory_space<vmem>>, vector<3x8xf32>
    tpu.vector_store %arg15[%c0_69, %c0_70], %89 {strides = array<i32>} : memref<4x24xf32, #tpu.memory_space<vmem>>, vector<3x8xf32>,
    %cst_71 = arith.constant 0.000000e+00 : f32
    %91 = vector.broadcast %cst_71 : f32 to vector<12x4xf32>
    %92 = vector.extract_strided_slice %88 {offsets = [0, 8], sizes = [3, 4], strides = [1, 1]} : vector<3x24xf32> to vector<3x4xf32>
    %c0_72 = arith.constant 0 : index
    %c0_73 = arith.constant 0 : index
    %93 = vector.load %arg12[%c0_72, %c0_73] : memref<12x12xf32, #tpu.memory_space<vmem>>, vector<12x3xf32>
    %cst_74 = arith.constant dense<0.000000e+00> : vector<12x4xf32>
    %94 = tpu.matmul %93, %92, %cst_74 {dimension_numbers = #tpu.dot_dimension_numbers<[1], [0], [0], [1], [0, 0, 1, 1], [], []>} : vector<12x3xf32>, vector<3x4xf32>, vector<12x4xf32> -> vector<12x4xf32>
    %95 = arith.addf %91, %94 : vector<12x4xf32>
    %96 = vector.extract_strided_slice %88 {offsets = [0, 12], sizes = [3, 4], strides = [1, 1]} : vector<3x24xf32> to vector<3x4xf32>
    %c0_75 = arith.constant 0 : index
    %c3_76 = arith.constant 3 : index
    %97 = vector.load %arg12[%c0_75, %c3_76] : memref<12x12xf32, #tpu.memory_space<vmem>>, vector<12x3xf32>
    %cst_77 = arith.constant dense<0.000000e+00> : vector<12x4xf32>
    %98 = tpu.matmul %97, %96, %cst_77 {dimension_numbers = #tpu.dot_dimension_numbers<[1], [0], [0], [1], [0, 0, 1, 1], [], []>} : vector<12x3xf32>, vector<3x4xf32>, vector<12x4xf32> -> vector<12x4xf32>
    %99 = arith.addf %95, %98 : vector<12x4xf32>
    %100 = vector.extract_strided_slice %88 {offsets = [0, 16], sizes = [3, 4], strides = [1, 1]} : vector<3x24xf32> to vector<3x4xf32>
    %c0_78 = arith.constant 0 : index
    %c6_79 = arith.constant 6 : index
    %101 = vector.load %arg12[%c0_78, %c6_79] : memref<12x12xf32, #tpu.memory_space<vmem>>, vector<12x3xf32>
    %cst_80 = arith.constant dense<0.000000e+00> : vector<12x4xf32>
    %102 = tpu.matmul %101, %100, %cst_80 {dimension_numbers = #tpu.dot_dimension_numbers<[1], [0], [0], [1], [0, 0, 1, 1], [], []>} : vector<12x3xf32>, vector<3x4xf32>, vector<12x4xf32> -> vector<12x4xf32>
    %103 = arith.addf %99, %102 : vector<12x4xf32>
    %104 = vector.extract_strided_slice %88 {offsets = [0, 20], sizes = [3, 4], strides = [1, 1]} : vector<3x24xf32> to vector<3x4xf32>
    %c0_81 = arith.constant 0 : index
    %c9 = arith.constant 9 : index
    %105 = vector.load %arg12[%c0_81, %c9] : memref<12x12xf32, #tpu.memory_space<vmem>>, vector<12x3xf32>
    %cst_82 = arith.constant dense<0.000000e+00> : vector<12x4xf32>
    %106 = tpu.matmul %105, %104, %cst_82 {dimension_numbers = #tpu.dot_dimension_numbers<[1], [0], [0], [1], [0, 0, 1, 1], [], []>} : vector<12x3xf32>, vector<3x4xf32>, vector<12x4xf32> -> vector<12x4xf32>
    %107 = arith.addf %103, %106 : vector<12x4xf32>
    %c0_83 = arith.constant 0 : index
    %c0_84 = arith.constant 0 : index
    %108 = vector.load %arg13[%c0_83, %c0_84] : memref<12x1xf32, #tpu.memory_space<vmem>>, vector<12x1xf32>
    %109 = vector.broadcast %108 : vector<12x1xf32> to vector<12x4xf32>
    %110 = arith.addf %107, %109 : vector<12x4xf32>
    %111 = vector.extract_strided_slice %110 {offsets = [0, 0], sizes = [3, 4], strides = [1, 1]} : vector<12x4xf32> to vector<3x4xf32>
    %c0_85 = arith.constant 0 : index
    %c8_86 = arith.constant 8 : index
    %112 = vector.load %arg15[%c0_85, %c8_86] : memref<4x24xf32, #tpu.memory_space<vmem>>, vector<3x4xf32>
    tpu.vector_store %arg15[%c0_85, %c8_86], %111 {strides = array<i32>} : memref<4x24xf32, #tpu.memory_space<vmem>>, vector<3x4xf32>,
    %113 = vector.extract_strided_slice %110 {offsets = [3, 0], sizes = [3, 4], strides = [1, 1]} : vector<12x4xf32> to vector<3x4xf32>
    %c0_87 = arith.constant 0 : index
    %c12_88 = arith.constant 12 : index
    %114 = vector.load %arg15[%c0_87, %c12_88] : memref<4x24xf32, #tpu.memory_space<vmem>>, vector<3x4xf32>
    tpu.vector_store %arg15[%c0_87, %c12_88], %113 {strides = array<i32>} : memref<4x24xf32, #tpu.memory_space<vmem>>, vector<3x4xf32>,
    %115 = vector.extract_strided_slice %110 {offsets = [6, 0], sizes = [3, 4], strides = [1, 1]} : vector<12x4xf32> to vector<3x4xf32>
    %c0_89 = arith.constant 0 : index
    %c16_90 = arith.constant 16 : index
    %116 = vector.load %arg15[%c0_89, %c16_90] : memref<4x24xf32, #tpu.memory_space<vmem>>, vector<3x4xf32>
    tpu.vector_store %arg15[%c0_89, %c16_90], %115 {strides = array<i32>} : memref<4x24xf32, #tpu.memory_space<vmem>>, vector<3x4xf32>,
    %117 = vector.extract_strided_slice %110 {offsets = [9, 0], sizes = [3, 4], strides = [1, 1]} : vector<12x4xf32> to vector<3x4xf32>
    %c0_91 = arith.constant 0 : index
    %c20_92 = arith.constant 20 : index
    %118 = vector.load %arg15[%c0_91, %c20_92] : memref<4x24xf32, #tpu.memory_space<vmem>>, vector<3x4xf32>
    tpu.vector_store %arg15[%c0_91, %c20_92], %117 {strides = array<i32>} : memref<4x24xf32, #tpu.memory_space<vmem>>, vector<3x4xf32>,
    %c0_93 = arith.constant 0 : index
    %c8_94 = arith.constant 8 : index
    %119 = vector.load %arg15[%c0_93, %c8_94] : memref<4x24xf32, #tpu.memory_space<vmem>>, vector<4x16xf32>
    %c0_95 = arith.constant 0 : index
    %c0_96 = arith.constant 0 : index
    %120 = vector.load %arg14[%c0_95, %c0_96] : memref<4x16xf32, #tpu.memory_space<vmem>>, vector<4x16xf32>
    tpu.vector_store %arg14[%c0_95, %c0_96], %119 {strides = array<i32>} : memref<4x16xf32, #tpu.memory_space<vmem>>, vector<4x16xf32>,
    return
  }
}

</mosaic_0001>

<bundles_post_ra>
// kernel: flowgnn_forward.1
= control target key start
LH: loop header
LB: loop body
LE: loop exit
PB: predicated region body
PF: predicated region fallthrough
CT: control target
= control target key end

     0   :  { %vm62_vm0 = vcmask 191488   ;;  %v1772_v0 = vmov 0.0   ;;  %vm1773_vm1 = vmmov 0   ;;  %v1774_v4 = vmov 0   ;;  %s1775_s22 = smov 127   ;;  %s1778_s23 = smov 112   ;;  %s2048_s1 = inlined_call_operand.vmem [shape: f32[1,24], index: 1, kind: input, shape index: {}]   ;;  %s2049_s2 = inlined_call_operand.<no memory space> [shape: f32[1,1], index: 2, kind: input, shape index: {}]   ;;  %s2050_s3 = inlined_call_operand.<no memory space> [shape: f32[1,1], index: 3, kind: input, shape index: {}]   ;;  %s2051_s0 = inlined_call_operand.vmem [shape: bf16[24,24], index: 0, kind: input, shape index: {}]   ;;  %s2052_s4 = inlined_call_operand.vmem [shape: f32[4,4], index: 4, kind: input, shape index: {}]   ;;  %s2053_s5 = inlined_call_operand.vmem [shape: f32[4,1], index: 5, kind: input, shape index: {}]   ;;  %s2054_s7 = inlined_call_operand.vmem [shape: f32[2,1], index: 7, kind: input, shape index: {}]   ;;  %s2055_s6 = inlined_call_operand.vmem [shape: f32[2,2], index: 6, kind: input, shape index: {}]   ;;  %s2056_s8 = inlined_call_operand.vmem [shape: f32[8,8], index: 8, kind: input, shape index: {}]   ;;  %s2057_s9 = inlined_call_operand.vmem [shape: f32[8,1], index: 9, kind: input, shape index: {}]   ;;  %s2058_s11 = inlined_call_operand.vmem [shape: f32[3,1], index: 11, kind: input, shape index: {}]   ;;  %s2059_s10 = inlined_call_operand.vmem [shape: f32[3,3], index: 10, kind: input, shape index: {}]   ;;  %s2060_s12 = inlined_call_operand.vmem [shape: f32[12,12], index: 12, kind: input, shape index: {}]   ;;  %s2061_s13 = inlined_call_operand.vmem [shape: f32[12,1], index: 13, kind: input, shape index: {}]   ;;  %s2062_s14 = inlined_call_operand.vmem [shape: f32[4,16], index: 14, kind: output, shape index: {}]  }
   0x1   :  { %1652 = vmatprep.subr.mxu0 %v1772_v0  ;;  %v1569_v1 = vld [vmem:[%s2048_s1] ss:$0 sm:$0xff]  ;;  %1654 = vmatprep.mubr.msk.f32.mxu0 %vm1773_vm1, %v1772_v0  ;;  %v19_v2 = vstv %s2049_s2  ;;  %v21_v3 = vstv %s2050_s3  ;;  %vm80_vm2 = vcmask 1040384   ;;  %vm168_vm3 = vcmask 1043456   ;;  %v1770_v5 = vld [vmem:[%s2051_s0 + $0x8] ss:$0 sps:$4 sm:$0xff]  }
   0x2   :  { %63 = vst.msk [vmem:[#allocation2] sm:$0xf] %vm62_vm0, %v1569_v1  ;;  %20 = vst [vmem:[#allocation3] sm:$0x1] %v19_v2  ;;  %1768 = vset.pattern.permute.xlu0 %v1774_v4  ;;  %1657 = vmatprep.subr.bf16.mxu1 %v1772_v0  ;;  %vm76_vm4 = vcmask 7168   ;;  %v1883_v9 = vsel %vm168_vm3, %v1770_v5, 0  ;;  %v72_v12 = vlaneseq }
   0x3   :  { %22 = vst [vmem:[#allocation4] sm:$0x1] %v21_v3  ;;  %1661 = vmatprep.mubr.msk.bf16.mxu1 %vm1773_vm1, %v1772_v0  ;;  %1769 = vset.pattern.permute.xlu1 %v1774_v4  ;;  %v1894_v10 = vld [vmem:[%s2051_s0] sm:$0xff]   ;;  %vm164_vm5 = vcmask 195584   ;;  %vm212_vm6 = vcmask 57344   ;;  %s1776_s0 = smov 120  }
   0x4   :  { %1658 = vmatpush3.bf16.msra.mxu1 %v1883_v9  ;;  %v214_v11 = vld [vmem:[%s2052_s4] sm:$0xf]  ;;  %v73_v13 = vshrl.u32 %v72_v12, 7  ;;  %s1777_s4 = smov 116   ;;  %s1779_s24 = smov 126   ;;  %vm540_vm7 = vcmask 90176  }
   0x5   :  { %1659 = vmatprep.subr.bf16.mxu1 %v1772_v0  ;;  %216 = vrot.lane.b32.xlu1 %v214_v11, %s1775_s22  ;;  %s1780_s25 = smov 108   ;;  %s1781_s26 = smov 125   ;;  %v529_v25 = vld [vmem:[%s2053_s5] sm:$0xf]  ;;  %vm545_vm8 = vcmask 124001   ;;  %vm550_vm9 = vcmask 157826  }
   0x6   :  { %v74_v14 = vsub.s32 0, %v73_v13  ;;  %s1782_s5 = smov 12   ;;  %s1783_s29 = smov 8   ;;  %v559_v46 = vld [vmem:[%s2054_s7] sm:$0x3]  ;;  %vm555_vm10 = vcmask 191651  }
   0x7   :  { %s1784_s30 = smov 20   ;;  %s1785_s15 = smov 16   ;;  %vm569_vm11 = vcmask 1041408   ;;  %v558_v51 = vld [vmem:[%s2055_s6] sm:$0x3]  ;;  %vm565_vm12 = vcmask 15360  }
   0x8   :  { %1660 = vmatpush3.bf16.msra.mxu1 %v1894_v10  ;;  %v689_v53 = vld [vmem:[%s2056_s8] sm:$0xff]  ;;  %vm687_vm13 = vcmask 58368   ;;  %s1786_s2 = smov 124   ;;  %s1787_s3 = smov 122   ;;  %vm1015_vm14 = vcmask 91200   ;;  %vm1020_vm15 = vcmask 126050  }
   0x9   :  { %v64_v6 = vld [vmem:[#allocation2] sm:$0x1]  ;;  %v65_v7 = vld [vmem:[#allocation3] sm:$0x1]  ;;  %1680 = vmatprep.subr.mxu1 %v1772_v0  ;;  %vm1025_vm0 = vcmask 160900   ;;  %vm1040_vm3 = vcmask 23552  }
   0xa   :  { %v66_v8 = vld [vmem:[#allocation4] sm:$0x1]  ;;  %1653 = vmatpush3.msk.msra.mxu0 %vm80_vm2, %v64_v6 }
   0xb   :  { %69 = vperm.xlu0 %1768, %v66_v8   ;;  %1655 = vmatmul.mubr.msk.f32.vlgmr.msra.gmra.mxu0 %vm76_vm4, %v65_v7  ;;  %v1004_v63 = vld [vmem:[%s2057_s9] sm:$0xff] }
   0xc   :  { %1665 = vmatprep.subr.mxu0 %v1772_v0  ;;  %1667 = vmatprep.mubr.msk.f32.mxu0 %vm1773_vm1, %v1772_v0 }
  0x77   :  { %v217_v26 = vpop.permute.xlu1 %216 }
  0x86   :  { %v70_v15 = vpop.permute.xlu0 %69 }
  0x87   :  { %v75_v16 = vrot.slane %v70_v15, %v74_v14 }
  0xcb   :  { %v150_v17 = vpop.f32.mrf.mxu0 }
  0xcc   :  { %v151_v18 = vadd.f32 %v150_v17, %v75_v16 }
  0xcd   :  { %v1656_v19 = vpop.f32.mrf.mxu0 }
  0xce   :  { %v154_v20 = vpack.c.bf16 %v151_v18, %v151_v18 }
  0xd0   :  { %1662 = vmatmul.mubr.msk.bf16.vlgmr.msra.gmra.mxu1 %vm164_vm5, %v154_v20 }
  0xd1   :  { %1682 = vmatprep.mubr.msk.f32.mxu1 %vm1773_vm1, %v1772_v0 }
 0x190   :  { %v206_v21 = vpop.f32.mrf.mxu1 }
 0x191   :  { %295 = vrot.lane.b32.xlu1 %v206_v21, %s1776_s0  ;;  %219 = vrot.lane.b32.xlu0 %v206_v21, %s1777_s4  ;;  %213 = vst.msk [vmem:[#allocation2] sm:$0x1] %vm212_vm6, %v206_v21  ;;  %vm1540_vm6 = vcmask 128099  }
 0x192   :  { %v1663_v22 = vpop.f32.mrf.mxu1 }
 0x194   :  { %v209_v23 = vpop.f32.mrf.mxu1 }
 0x195   :  { %373 = vrot.lane.b32.xlu0 %v206_v21, %s1778_s23  ;;  %371 = vrot.lane.b32.xlu1 %v214_v11, %s1779_s24 }
 0x196   :  { %v1664_v24 = vpop.f32.mrf.mxu1 }
 0x199   :  { %452 = vrot.lane.b32.xlu0 %v206_v21, %s1780_s25  ;;  %450 = vrot.lane.b32.xlu1 %v214_v11, %s1781_s26 }
 0x19d   :  { %532 = vperm.xlu0 %1768, %v529_v25   ;;  %v1033_v25 = vld [vmem:[%s2059_s10] sm:$0x7]  ;;  %s1788_s10 = smov 119  }
 0x203   :  { %v296_v27 = vpop.permute.xlu1 %295  ;;  %v220_v28 = vpop.permute.xlu0 %219 }
 0x204   :  { %1666 = vmatpush3.msk.msra.mxu0 %vm80_vm2, %v220_v28  ;;  %v1165_v28 = vld [vmem:[%s2060_s12 + $0x8] sm:$0xf] }
 0x205   :  { %1668 = vmatmul.mubr.msk.f32.vlgmr.msra.gmra.mxu0 %vm76_vm4, %v217_v26  ;;  %1670 = vmatprep.subr.mxu0 %v1772_v0 }
 0x206   :  { %1671 = vmatpush3.msk.msra.mxu0 %vm80_vm2, %v296_v27  ;;  %1672 = vmatprep.mubr.msk.f32.mxu0 %vm1773_vm1, %v1772_v0  ;;  %v1164_v27 = vld [vmem:[%s2060_s12] sm:$0xff] }
 0x207   :  { %v374_v29 = vpop.permute.xlu0 %373  ;;  %1675 = vmatprep.subr.mxu0 %v1772_v0  ;;  %v372_v30 = vpop.permute.xlu1 %371 }
 0x209   :  { %1673 = vmatmul.mubr.msk.f32.vlgmr.msra.gmra.mxu0 %vm76_vm4, %v214_v11 }
 0x20a   :  { %1676 = vmatpush3.msk.msra.mxu0 %vm80_vm2, %v374_v29  ;;  %1677 = vmatprep.mubr.msk.f32.mxu0 %vm1773_vm1, %v1772_v0 }
 0x20b   :  { %v453_v31 = vpop.permute.xlu0 %452  ;;  %v451_v32 = vpop.permute.xlu1 %450  ;;  %1685 = vmatprep.subr.mxu0 %v1772_v0 }
 0x20c   :  { %1681 = vmatpush3.msk.msra.mxu1 %vm80_vm2, %v453_v31  ;;  %vm1044_vm2 = vcmask 1042432  }
 0x20d   :  { %1678 = vmatmul.mubr.msk.f32.vlgmr.msra.gmra.mxu0 %vm76_vm4, %v372_v30  ;;  %1683 = vmatmul.mubr.msk.f32.vlgmr.msra.gmra.mxu1 %vm76_vm4, %v451_v32  ;;  %vm1162_vm4 = vcmask 59392  }
 0x20e   :  { %1687 = vmatprep.mubr.msk.f32.mxu0 %vm1773_vm1, %v1772_v0  ;;  %1690 = vmatprep.subr.bf16.mxu1 %v1772_v0 }
 0x20f   :  { %1691 = vmatpush3.bf16.msra.mxu1 %v1883_v9  ;;  %1694 = vmatprep.mubr.msk.bf16.mxu1 %vm1773_vm1, %v1772_v0 }
 0x210   :  { %1692 = vmatprep.subr.bf16.mxu1 %v1772_v0 }
 0x213   :  { %1693 = vmatpush3.bf16.msra.mxu1 %v1894_v10 }
 0x214   :  { %1713 = vmatprep.subr.mxu1 %v1772_v0 }
 0x218   :  { %v533_v44 = vpop.permute.xlu0 %532 }
 0x2c5   :  { %v291_v33 = vpop.f32.mrf.mxu0 }
 0x2c7   :  { %v1669_v34 = vpop.f32.mrf.mxu0 }
 0x2c9   :  { %v367_v35 = vpop.f32.mrf.mxu0 }
 0x2ca   :  { %v368_v37 = vadd.f32 %v367_v35, %v291_v33 }
 0x2cb   :  { %v1674_v36 = vpop.f32.mrf.mxu0 }
 0x2cd   :  { %v445_v38 = vpop.f32.mrf.mxu0  ;;  %v524_v39 = vpop.f32.mrf.mxu1 }
 0x2ce   :  { %v449_v40 = vadd.f32 %v445_v38, %v368_v37 }
 0x2cf   :  { %v1679_v41 = vpop.f32.mrf.mxu0  ;;  %v1684_v42 = vpop.f32.mrf.mxu1 }
 0x2d0   :  { %v528_v43 = vadd.f32 %v524_v39, %v449_v40  ;;  %v1518_v39 = vld [vmem:[%s2061_s13 + $0x8] sm:$0xf]  ;;  %v1517_v40 = vld [vmem:[%s2061_s13] sm:$0xff] }
 0x2d2   :  { %v535_v45 = vadd.f32 %v533_v44, %v528_v43 }
 0x2d4   :  { %542 = vrot.lane.b32.xlu0 %v535_v45, %s1782_s5  ;;  %537 = vrot.lane.b32.xlu1 %v535_v45, %s1783_s29 }
 0x2d8   :  { %552 = vrot.lane.b32.xlu0 %v535_v45, %s1784_s30  ;;  %547 = vrot.lane.b32.xlu1 %v535_v45, %s1785_s15 }
 0x2dc   :  { %562 = vperm.xlu1 %1769, %v559_v46  }
 0x2e0   :  { %691 = vrot.lane.b32.xlu1 %v689_v53, %s1779_s24 }
 0x346   :  { %v543_v47 = vpop.permute.xlu0 %542  ;;  %v538_v48 = vpop.permute.xlu1 %537 }
 0x347   :  { %541 = vst.msk [vmem:[#allocation2] sm:$0x1] %vm540_vm7, %v538_v48  ;;  %vm1551_vm7 = vcmask 155776  }
 0x348   :  { %546 = vst.msk [vmem:[#allocation2 - $0x1] sm:$0x2] %vm545_vm8, %v543_v47  ;;  %vm1549_vm8 = vcmask 162950  }
 0x34a   :  { %v553_v49 = vpop.permute.xlu0 %552  ;;  %v548_v50 = vpop.permute.xlu1 %547 }
 0x34b   :  { %551 = vst.msk [vmem:[#allocation2 - $0x2] sm:$0x4] %vm550_vm9, %v548_v50  ;;  %vm1556_vm9 = vcmask 191649  }
 0x34c   :  { %556 = vst.msk [vmem:[#allocation2 - $0x3] sm:$0x8] %vm555_vm10, %v553_v49  ;;  %vm1563_vm10 = vcmask 125952  }
 0x353   :  { %v557_v52 = vld [vmem:[#allocation2] sm:$0x3] }
 0x354   :  { %1686 = vmatpush3.msk.msra.mxu0 %vm569_vm11, %v557_v52 }
 0x355   :  { %1688 = vmatmul.mubr.msk.f32.vlgmr.msra.gmra.mxu0 %vm565_vm12, %v558_v51  ;;  %1698 = vmatprep.subr.mxu0 %v1772_v0 }
 0x356   :  { %1700 = vmatprep.mubr.msk.f32.mxu0 %vm1773_vm1, %v1772_v0 }
 0x357   :  { %v563_v54 = vpop.permute.xlu1 %562 }
 0x35b   :  { %v692_v1 = vpop.permute.xlu1 %691 }
 0x415   :  { %v639_v55 = vpop.f32.mrf.mxu0 }
 0x416   :  { %v640_v56 = vadd.f32 %v639_v55, %v563_v54 }
 0x417   :  { %v1689_v57 = vpop.f32.mrf.mxu0 }
 0x418   :  { %v643_v58 = vpack.c.bf16 %v640_v56, %v640_v56 }
 0x41a   :  { %1695 = vmatmul.mubr.msk.bf16.vlgmr.msra.gmra.mxu1 %vm164_vm5, %v643_v58 }
 0x41b   :  { %1715 = vmatprep.mubr.msk.f32.mxu1 %vm1773_vm1, %v1772_v0 }
 0x4da   :  { %v681_v59 = vpop.f32.mrf.mxu1 }
 0x4db   :  { %688 = vst.msk [vmem:[#allocation2] sm:$0x3] %vm687_vm13, %v681_v59  ;;  %848 = vrot.lane.b32.xlu1 %v681_v59, %s1778_s23  ;;  %694 = vrot.lane.b32.xlu0 %v681_v59, %s1777_s4 }
 0x4dc   :  { %v1696_v60 = vpop.f32.mrf.mxu1 }
 0x4de   :  { %v684_v61 = vpop.f32.mrf.mxu1 }
 0x4df   :  { %927 = vrot.lane.b32.xlu1 %v681_v59, %s1780_s25  ;;  %770 = vrot.lane.b32.xlu0 %v681_v59, %s1776_s0 }
 0x4e0   :  { %v1697_v62 = vpop.f32.mrf.mxu1 }
 0x4e3   :  { %1007 = vperm.xlu1 %1769, %v1004_v63   ;;  %846 = vrot.lane.b32.xlu0 %v689_v53, %s1786_s2 }
 0x4e7   :  { %925 = vrot.lane.b32.xlu0 %v689_v53, %s1787_s3 }
 0x54d   :  { %v849_v2 = vpop.permute.xlu1 %848  ;;  %v695_v3 = vpop.permute.xlu0 %694 }
 0x54e   :  { %1699 = vmatpush3.msk.msra.mxu0 %vm569_vm11, %v695_v3 }
 0x54f   :  { %1701 = vmatmul.mubr.msk.f32.vlgmr.msra.gmra.mxu0 %vm565_vm12, %v692_v1  ;;  %1703 = vmatprep.subr.mxu0 %v1772_v0 }
 0x550   :  { %1705 = vmatprep.mubr.msk.f32.mxu0 %vm1773_vm1, %v1772_v0 }
 0x551   :  { %v928_v4 = vpop.permute.xlu1 %927  ;;  %v771_v5 = vpop.permute.xlu0 %770 }
 0x552   :  { %1704 = vmatpush3.msk.msra.mxu0 %vm569_vm11, %v771_v5  ;;  %1714 = vmatpush3.msk.msra.mxu1 %vm569_vm11, %v928_v4 }
 0x553   :  { %1706 = vmatmul.mubr.msk.f32.vlgmr.msra.gmra.mxu0 %vm565_vm12, %v689_v53  ;;  %1708 = vmatprep.subr.mxu0 %v1772_v0 }
 0x554   :  { %1709 = vmatpush3.msk.msra.mxu0 %vm569_vm11, %v849_v2  ;;  %1710 = vmatprep.mubr.msk.f32.mxu0 %vm1773_vm1, %v1772_v0 }
 0x555   :  { %v847_v6 = vpop.permute.xlu0 %846  ;;  %1718 = vmatprep.subr.mxu0 %v1772_v0  ;;  %1723 = vmatprep.subr.bf16.mxu1 %v1772_v0 }
 0x557   :  { %1711 = vmatmul.mubr.msk.f32.vlgmr.msra.gmra.mxu0 %vm565_vm12, %v847_v6 }
 0x558   :  { %1720 = vmatprep.mubr.msk.f32.mxu0 %vm1773_vm1, %v1772_v0 }
 0x559   :  { %v926_v7 = vpop.permute.xlu0 %925 }
 0x55a   :  { %1716 = vmatmul.mubr.msk.f32.vlgmr.msra.gmra.mxu1 %vm565_vm12, %v926_v7 }
 0x55b   :  { %1724 = vmatpush3.bf16.msra.mxu1 %v1883_v9  ;;  %1727 = vmatprep.mubr.msk.bf16.mxu1 %vm1773_vm1, %v1772_v0  ;;  %vm1030_vm1 = vcmask 195750  }
 0x55c   :  { %1725 = vmatprep.subr.bf16.mxu1 %v1772_v0  ;;  %v1034_v0 = vld [vmem:[%s2058_s11] sm:$0x7] }
 0x55e   :  { %v1008_v20 = vpop.permute.xlu1 %1007 }
 0x55f   :  { %1726 = vmatpush3.bf16.msra.mxu1 %v1894_v10 }
 0x60f   :  { %v766_v8 = vpop.f32.mrf.mxu0 }
 0x611   :  { %v1702_v11 = vpop.f32.mrf.mxu0 }
 0x613   :  { %v842_v12 = vpop.f32.mrf.mxu0 }
 0x614   :  { %v843_v14 = vadd.f32 %v842_v12, %v766_v8 }
 0x615   :  { %v1707_v13 = vpop.f32.mrf.mxu0 }
 0x617   :  { %v920_v15 = vpop.f32.mrf.mxu0 }
 0x618   :  { %v924_v16 = vadd.f32 %v920_v15, %v843_v14 }
 0x619   :  { %v1712_v17 = vpop.f32.mrf.mxu0 }
 0x61a   :  { %v999_v18 = vpop.f32.mrf.mxu1 }
 0x61b   :  { %v1003_v19 = vadd.f32 %v999_v18, %v924_v16 }
 0x61c   :  { %v1717_v21 = vpop.f32.mrf.mxu1 }
 0x61d   :  { %v1010_v9 = vadd.f32 %v1008_v20, %v1003_v19 }
 0x61f   :  { %1017 = vrot.lane.b32.xlu1 %v1010_v9, %s1782_s5  ;;  %1012 = vrot.lane.b32.xlu0 %v1010_v9, %s1783_s29 }
 0x623   :  { %1027 = vrot.lane.b32.xlu1 %v1010_v9, %s1784_s30  ;;  %1022 = vrot.lane.b32.xlu0 %v1010_v9, %s1785_s15 }
 0x627   :  { %1037 = vperm.xlu0 %1768, %v1034_v0   ;;  %1170 = vrot.lane.b32.xlu1 %v1165_v28, %s1781_s26 }
 0x62b   :  { %1168 = vrot.lane.b32.xlu0 %v1164_v27, %s1781_s26 }
 0x62f   :  { %1339 = vrot.lane.b32.xlu0 %v1164_v27, %s1787_s3 }
 0x691   :  { %v1018_v10 = vpop.permute.xlu1 %1017  ;;  %v1013_v22 = vpop.permute.xlu0 %1012 }
 0x692   :  { %1016 = vst.msk [vmem:[#allocation2] sm:$0x3] %vm1015_vm14, %v1013_v22 }
 0x693   :  { %1021 = vst.msk [vmem:[#allocation2 - $0x2] sm:$0xc] %vm1020_vm15, %v1018_v10 }
 0x695   :  { %v1028_v23 = vpop.permute.xlu1 %1027  ;;  %v1023_v24 = vpop.permute.xlu0 %1022 }
 0x696   :  { %1026 = vst.msk [vmem:[#allocation2 - $0x4] sm:$0x30] %vm1025_vm0, %v1023_v24 }
 0x697   :  { %1031 = vst.msk [vmem:[#allocation2 - $0x6] sm:$0xc0] %vm1030_vm1, %v1028_v23 }
 0x699   :  { %v1171_v41 = vpop.permute.xlu1 %1170 }
 0x69e   :  { %v1032_v26 = vld [vmem:[#allocation2] sm:$0x7] }
 0x69f   :  { %1719 = vmatpush3.msk.msra.mxu0 %vm1044_vm2, %v1032_v26 }
 0x6a0   :  { %1721 = vmatmul.mubr.msk.f32.vlgmr.msra.gmra.mxu0 %vm1040_vm3, %v1033_v25 }
 0x6a2   :  { %v1038_v29 = vpop.permute.xlu0 %1037 }
 0x6a6   :  { %v1169_v34 = vpop.permute.xlu0 %1168 }
 0x6a7   :  { %1733 = vmatprep.mubr.msk.f32.mxu0 %vm1040_vm3, %v1169_v34 }
 0x6aa   :  { %v1340_v42 = vpop.permute.xlu0 %1339 }
 0x760   :  { %v1114_v30 = vpop.f32.mrf.mxu0 }
 0x761   :  { %v1115_v31 = vadd.f32 %v1114_v30, %v1038_v29 }
 0x762   :  { %v1722_v32 = vpop.f32.mrf.mxu0 }
 0x763   :  { %v1118_v33 = vpack.c.bf16 %v1115_v31, %v1115_v31 }
 0x765   :  { %1728 = vmatmul.mubr.msk.bf16.vlgmr.msra.gmra.mxu1 %vm164_vm5, %v1118_v33  ;;  %vm1535_vm5 = vcmask 92224  }
 0x825   :  { %v1156_v35 = vpop.f32.mrf.mxu1 }
 0x826   :  { %1163 = vst.msk [vmem:[#allocation2] sm:$0x7] %vm1162_vm4, %v1156_v35  ;;  %1256 = vrot.lane.b32.xlu0 %v1156_v35, %s1776_s0  ;;  %1173 = vrot.lane.b32.xlu1 %v1156_v35, %s1777_s4 }
 0x827   :  { %v1729_v36 = vpop.f32.mrf.mxu1 }
 0x829   :  { %v1159_v37 = vpop.f32.mrf.mxu1 }
 0x82a   :  { %1432 = vrot.lane.b32.xlu0 %v1156_v35, %s1780_s25  ;;  %1341 = vrot.lane.b32.xlu1 %v1165_v28, %s1787_s3 }
 0x82b   :  { %v1730_v38 = vpop.f32.mrf.mxu1 }
 0x82e   :  { %1430 = vrot.lane.b32.xlu0 %v1165_v28, %s1788_s10  ;;  %1343 = vrot.lane.b32.xlu1 %v1156_v35, %s1778_s23 }
 0x832   :  { %1526 = vperm.xlu0 %1768, %v1518_v39   ;;  %1428 = vrot.lane.b32.xlu1 %v1164_v27, %s1788_s10 }
 0x836   :  { %1521 = vperm.xlu1 %1769, %v1517_v40  }
 0x898   :  { %v1257_v43 = vpop.permute.xlu0 %1256  ;;  %v1174_v44 = vpop.permute.xlu1 %1173 }
 0x899   :  { %1731 = vmatprep.subr.msk.mxu0 %vm1044_vm2, %v1174_v44 }
 0x89a   :  { %1732 = vmatpush3.msk.msra.mxu0 %vm1044_vm2, %v1174_v44 }
 0x89b   :  { %1734 = vmatmul.mubr.msk.f32.vlgmr.msra.gmra.mxu0 %vm1040_vm3, %v1171_v41  ;;  %1736 = vmatprep.subr.msk.mxu0 %vm1044_vm2, %v1257_v43 }
 0x89c   :  { %v1433_v45 = vpop.permute.xlu0 %1432  ;;  %1737 = vmatpush3.msk.msra.mxu0 %vm1044_vm2, %v1257_v43  ;;  %v1342_v46 = vpop.permute.xlu1 %1341  ;;  %1738 = vmatprep.mubr.msk.f32.mxu0 %vm1040_vm3, %v1164_v27 }
 0x89d   :  { %1746 = vmatprep.subr.msk.mxu1 %vm1044_vm2, %v1433_v45 }
 0x89e   :  { %1747 = vmatpush3.msk.msra.mxu1 %vm1044_vm2, %v1433_v45 }
 0x89f   :  { %1739 = vmatmul.mubr.msk.f32.vlgmr.msra.gmra.mxu0 %vm1040_vm3, %v1165_v28 }
 0x8a0   :  { %1743 = vmatprep.mubr.msk.f32.mxu0 %vm1040_vm3, %v1340_v42  ;;  %v1344_v47 = vpop.permute.xlu1 %1343  ;;  %v1431_v48 = vpop.permute.xlu0 %1430 }
 0x8a1   :  { %1741 = vmatprep.subr.msk.mxu0 %vm1044_vm2, %v1344_v47 }
 0x8a2   :  { %1742 = vmatpush3.msk.msra.mxu0 %vm1044_vm2, %v1344_v47 }
 0x8a3   :  { %1744 = vmatmul.mubr.msk.f32.vlgmr.msra.gmra.mxu0 %vm1040_vm3, %v1342_v46 }
 0x8a4   :  { %v1429_v49 = vpop.permute.xlu1 %1428 }
 0x8a5   :  { %1748 = vmatprep.mubr.msk.f32.mxu1 %vm1040_vm3, %v1429_v49 }
 0x8a6   :  { %1749 = vmatmul.mubr.msk.f32.vlgmr.msra.gmra.mxu1 %vm1040_vm3, %v1431_v48 }
 0x8ad   :  { %v1527_v3 = vpop.permute.xlu0 %1526 }
 0x8b1   :  { %v1522_v63 = vpop.permute.xlu1 %1521 }
 0x95b   :  { %v1735_v50 = vpop.f32.mrf.mxu0 }
 0x95d   :  { %v1247_v51 = vpop.f32.mrf.mxu0 }
 0x95f   :  { %v1740_v52 = vpop.f32.mrf.mxu0 }
 0x960   :  { %v1336_v56 = vadd.f32 %v1740_v52, %v1735_v50 }
 0x961   :  { %v1330_v53 = vpop.f32.mrf.mxu0 }
 0x962   :  { %v1331_v55 = vadd.f32 %v1330_v53, %v1247_v51 }
 0x963   :  { %v1745_v54 = vpop.f32.mrf.mxu0 }
 0x964   :  { %v1427_v60 = vadd.f32 %v1745_v54, %v1336_v56 }
 0x965   :  { %v1417_v57 = vpop.f32.mrf.mxu0 }
 0x966   :  { %v1426_v58 = vadd.f32 %v1417_v57, %v1331_v55  ;;  %v1750_v59 = vpop.f32.mrf.mxu1 }
 0x967   :  { %v1516_v1 = vadd.f32 %v1750_v59, %v1427_v60 }
 0x968   :  { %v1506_v61 = vpop.f32.mrf.mxu1 }
 0x969   :  { %v1515_v62 = vadd.f32 %v1506_v61, %v1426_v58  ;;  %v1530_v4 = vadd.f32 %v1527_v3, %v1516_v1 }
 0x96b   :  { %v1529_v2 = vadd.f32 %v1522_v63, %v1515_v62 }
 0x96d   :  { %1537 = vrot.lane.b32.xlu0 %v1529_v2, %s1782_s5  ;;  %1532 = vrot.lane.b32.xlu1 %v1529_v2, %s1783_s29 }
 0x971   :  { %1545 = vrot.lane.b32.xlu0 %v1530_v4, %s1785_s15  ;;  %1543 = vrot.lane.b32.xlu1 %v1529_v2, %s1785_s15 }
 0x975   :  { %1553 = vrot.lane.b32.xlu1 %v1530_v4, %s1784_s30 }
 0x9df   :  { %v1538_v5 = vpop.permute.xlu0 %1537  ;;  %v1533_v6 = vpop.permute.xlu1 %1532 }
 0x9e0   :  { %1536 = vst.msk [vmem:[#allocation2] sm:$0x7] %vm1535_vm5, %v1533_v6 }
 0x9e1   :  { %1541 = vst.msk [vmem:[#allocation2 - $0x3] sm:$0x38] %vm1540_vm6, %v1538_v5 }
 0x9e3   :  { %v1546_v7 = vpop.permute.xlu0 %1545  ;;  %v1544_v8 = vpop.permute.xlu1 %1543 }
 0x9e4   :  { %1552 = vst.msk [vmem:[#allocation2 + $0x2] sm:$0x1] %vm1551_vm7, %v1546_v7 }
 0x9e5   :  { %1550 = vst.msk [vmem:[#allocation2 - $0x6] sm:$0xc0] %vm1549_vm8, %v1544_v8 }
 0x9e7   :  { %v1554_v11 = vpop.permute.xlu1 %1553 }
 0x9e8   :  { %1557 = vst.msk [vmem:[#allocation2 - $0x1] sm:$0xe] %vm1556_vm9, %v1554_v11 }
 0x9ef   :  { %v1558_v12 = vld [vmem:[#allocation2] sm:$0xf] }
 0x9f0   :  { %1560 = vrot.lane.b32.xlu0 %v1558_v12, %s1776_s0 }
 0xa62   :  { %v1561_v13 = vpop.permute.xlu0 %1560 }
 0xa63   :  { %1564 = vst.msk [vmem:[%s2062_s14] sm:$0xf] %vm1563_vm10, %v1561_v13 }

</bundles_post_ra>
